<compile_context>
chip_gen: v6e
topology: v6e:2x2x1
jax: 0.10.0
libtpu: 0.0.40
codegen_flags: <defaults>
</compile_context>

<pallas_src>
import functools
import math

import jax
import jax.numpy as jnp
from jax.experimental import pallas as pl
from jax.experimental.pallas import tpu as pltpu


# ----------------------------------------------------------------------------
# Pallas kernels
# ----------------------------------------------------------------------------
def _vmem_spec():
    return pl.BlockSpec(memory_space=pltpu.MemorySpace.VMEM)


def _linear_kernel(x_ref, w_ref, b_ref, o_ref):
    y = jnp.dot(x_ref[...], w_ref[...], preferred_element_type=jnp.float32)
    o_ref[...] = (y + b_ref[...]).astype(o_ref.dtype)


def pallas_linear(x, w, b):
    """y = x @ w + b; x:[N,Din], w:[Din,Dout], b:[1,Dout].  Used for the fused
    (Q|K|V|skip) and (Q|K|V) projections so the output is lane-dense."""
    n, dout = x.shape[0], w.shape[1]
    return pl.pallas_call(
        _linear_kernel,
        out_shape=jax.ShapeDtypeStruct((n, dout), jnp.float32),
        in_specs=[_vmem_spec()] * 3,
        out_specs=_vmem_spec(),
    )(x, w, b)


def _skip_mlp_kernel(x_ref, agg_ref, ws, bs, w1, b1, w2, b2, w3, b3, o_ref):
    # fused: clf_gnn skip projection (only for the gathered clf_nodes rows),
    # residual add with the attention aggregation, then clf1.tanh -> clf2.tanh
    # -> clf3.sigmoid.
    skip = jnp.dot(x_ref[...], ws[...], preferred_element_type=jnp.float32) + bs[...]
    h = agg_ref[...] + skip
    h = jnp.tanh(jnp.dot(h, w1[...], preferred_element_type=jnp.float32) + b1[...])
    h = jnp.tanh(jnp.dot(h, w2[...], preferred_element_type=jnp.float32) + b2[...])
    y = jax.nn.sigmoid(jnp.dot(h, w3[...], preferred_element_type=jnp.float32) + b3[...])
    o_ref[...] = y.astype(o_ref.dtype)


def pallas_skip_mlp(x_sel, agg_sel, ws, bs, w1, b1, w2, b2, w3, b3):
    n = x_sel.shape[0]
    args = (x_sel, agg_sel, ws, bs, w1, b1, w2, b2, w3, b3)
    return pl.pallas_call(
        _skip_mlp_kernel,
        out_shape=jax.ShapeDtypeStruct((n, w3.shape[1]), jnp.float32),
        in_specs=[_vmem_spec()] * len(args),
        out_specs=_vmem_spec(),
    )(*args)


def _bilstm_kernel(x_ref, m_ref, wx_ref, wh_ref, b_ref, o_ref, *, n_steps, m_batch):
    """One LSTM direction per grid step.

    x_ref : [1, T*M, 64]   time-major flattened input for this direction
    m_ref : [T*M, 1]       packed-sequence validity mask (shared by both dirs)
    wx_ref: [1, 64, 256]   fused (i|f|g|o) input weights
    wh_ref: [1, 64, 256]   fused (i|f|g|o) recurrent weights
    b_ref : [1, 1, 256]    fused gate bias
    o_ref : [1, T*M, 64]   masked hidden states (zeros on padded steps)
    """
    hidden = wh_ref.shape[1]
    wx = wx_ref[0]
    wh = wh_ref[0]
    b = b_ref[0]

    # Precompute the input contribution for ALL timesteps with one matmul;
    # only h @ Wh stays on the serial recurrence.
    xg = jnp.dot(x_ref[0], wx, preferred_element_type=jnp.float32) + b   # [T*M, 4H]

    h = jnp.zeros((m_batch, hidden), jnp.float32)
    c = jnp.zeros((m_batch, hidden), jnp.float32)
    for t in range(n_steps):                      # static unroll (T is tiny)
        lo = t * m_batch
        g = xg[lo:lo + m_batch] + jnp.dot(h, wh, preferred_element_type=jnp.float32)
        i_g = jax.nn.sigmoid(g[:, 0:hidden])
        f_g = jax.nn.sigmoid(g[:, hidden:2 * hidden])
        g_g = jnp.tanh(g[:, 2 * hidden:3 * hidden])
        o_g = jax.nn.sigmoid(g[:, 3 * hidden:4 * hidden])
        c_new = f_g * c + i_g * g_g
        h_new = o_g * jnp.tanh(c_new)
        m = m_ref[lo:lo + m_batch]                # [M, 1]; 0 => keep old state
        h = m * h_new + (1.0 - m) * h
        c = m * c_new + (1.0 - m) * c
        o_ref[0, lo:lo + m_batch, :] = (h * m).astype(o_ref.dtype)


def pallas_bilstm(x_stack, mask_flat, wx, wh, b, n_steps, m_batch):
    """x_stack:[2,T*M,64], mask_flat:[T*M,1], wx/wh:[2,64,256], b:[2,1,256]."""
    tm, d = x_stack.shape[1], x_stack.shape[2]
    hidden = wh.shape[1]
    return pl.pallas_call(
        functools.partial(_bilstm_kernel, n_steps=n_steps, m_batch=m_batch),
        out_shape=jax.ShapeDtypeStruct((2, tm, hidden), jnp.float32),
        grid=(2,),
        in_specs=[
            pl.BlockSpec((1, tm, d), lambda dir_: (dir_, 0, 0)),
            pl.BlockSpec((tm, 1), lambda dir_: (0, 0)),
            pl.BlockSpec((1, d, 4 * hidden), lambda dir_: (dir_, 0, 0)),
            pl.BlockSpec((1, hidden, 4 * hidden), lambda dir_: (dir_, 0, 0)),
            pl.BlockSpec((1, 1, 4 * hidden), lambda dir_: (dir_, 0, 0)),
        ],
        out_specs=pl.BlockSpec((1, tm, hidden), lambda dir_: (dir_, 0, 0)),
        compiler_params=pltpu.CompilerParams(dimension_semantics=("parallel",)),
    )(x_stack, mask_flat, wx, wh, b)


# ----------------------------------------------------------------------------
# Graph attention glue (segment softmax / scatter) — irregular, stays in JAX.
# ----------------------------------------------------------------------------
def graph_attention(q, k, v, edge_index, n_heads):
    n, c = q.shape
    d = c // n_heads
    src = edge_index[0]
    dst = edge_index[1]
    qh = q.reshape(n, n_heads, d)
    kh = k.reshape(n, n_heads, d)
    vh = v.reshape(n, n_heads, d)

    scores = (qh[dst] * kh[src]).sum(-1) / math.sqrt(d)           # [E, H]
    seg_max = jax.ops.segment_max(scores, dst, num_segments=n)
    ex = jnp.exp(scores - seg_max[dst])
    denom = jax.ops.segment_sum(ex, dst, num_segments=n)
    alpha = ex / (denom[dst] + 1e-16)                             # [E, H]
    msg = alpha[:, :, None] * vh[src]                             # [E, H, d]
    agg = jax.ops.segment_sum(msg, dst, num_segments=n).reshape(n, c)
    return agg, alpha


# ----------------------------------------------------------------------------
# Full model forward (mirrors Predict_model_with_att.forward)
# ----------------------------------------------------------------------------
def predict_model_forward(params, embeddings, edges, clf_neighbors, clf_nodes,
                          n_layers, n_heads):
    n_snap = len(embeddings)
    num_nodes = embeddings[0].shape[0]

    # --- neighbors GNN: batch all snapshots per layer (loop interchange) -----
    h_all = jnp.concatenate([e[:, :64] for e in embeddings], axis=0)   # [T*N, 64]
    for i in range(n_layers):
        lp = params["neighbors_gnn"][i]
        proj = pallas_linear(h_all, lp["w_qkvs"], lp["b_qkvs"])        # [T*N, 256]
        outs = []
        for t in range(n_snap):
            p_t = proj[t * num_nodes:(t + 1) * num_nodes]
            q, k, v, skip = (p_t[:, 0:64], p_t[:, 64:128],
                             p_t[:, 128:192], p_t[:, 192:256])
            agg, _ = graph_attention(q, k, v, edges[t], n_heads)
            outs.append(agg + skip)
        h_all = jnp.concatenate(outs, axis=0)
    final_per_snap = [h_all[t * num_nodes:(t + 1) * num_nodes] for t in range(n_snap)]
    # original code prepends each snapshot => time axis is reversed snapshot order
    embeds = jnp.stack(list(reversed(final_per_snap)), axis=1)         # [N, T, 64]

    temp = embeds[clf_neighbors]                                       # [M, T, 64]
    m_batch, t_len = temp.shape[0], temp.shape[1]
    lens = ((temp != 0).sum(2) != 0).sum(1)                            # [M]
    lens = jnp.minimum(lens, 5)

    # --- packed bidirectional LSTM (pack_padded_sequence -> masking) ---------
    t_idx = jnp.arange(t_len)
    valid = (t_idx[None, :] < lens[:, None]).astype(jnp.float32)       # [M, T]
    rev_idx = jnp.clip(lens[:, None] - 1 - t_idx[None, :], 0, t_len - 1)
    rev_idx3 = jnp.broadcast_to(rev_idx[:, :, None], temp.shape)
    temp_rev = jnp.take_along_axis(temp, rev_idx3, axis=1) * valid[:, :, None]

    x_fwd = jnp.transpose(temp, (1, 0, 2)).reshape(t_len * m_batch, 64)
    x_bwd = jnp.transpose(temp_rev, (1, 0, 2)).reshape(t_len * m_batch, 64)
    x_stack = jnp.stack([x_fwd, x_bwd], axis=0)                        # [2, T*M, 64]
    mask_flat = jnp.transpose(valid).reshape(t_len * m_batch, 1)       # [T*M, 1]

    lstm_out = pallas_bilstm(x_stack, mask_flat,
                             params["lstm_wx"], params["lstm_wh"], params["lstm_b"],
                             n_steps=t_len, m_batch=m_batch)           # [2, T*M, 64]
    lstm_out = lstm_out.reshape(2, t_len, m_batch, 64)
    fwd = jnp.transpose(lstm_out[0], (1, 0, 2))                        # [M, T, 64]
    bwd_rev = jnp.transpose(lstm_out[1], (1, 0, 2))
    rev_idx3h = jnp.broadcast_to(rev_idx[:, :, None], bwd_rev.shape)
    bwd = jnp.take_along_axis(bwd_rev, rev_idx3h, axis=1) * valid[:, :, None]

    seq = 0.5 * (fwd + bwd)                        # == view(...,2,64).mean(-2)
    max_len = jnp.maximum(jnp.max(lens), 1).astype(jnp.float32)
    seq_mean = seq.sum(axis=1) / max_len           # == .mean(1) over padded length

    # --- rebuild node embedding and run the classifier GNN ------------------
    emb_last = embeddings[-1]
    new_rows = jnp.concatenate([seq_mean, emb_last[clf_neighbors][:, 64:]], axis=-1)
    embedding = jnp.zeros_like(emb_last).at[clf_neighbors].set(new_rows)

    cg = params["clf_gnn"]
    c_dim = emb_last.shape[1]
    proj = pallas_linear(embedding, cg["w_qkv"], cg["b_qkv"])          # [N, 3C]
    q, k, v = proj[:, :c_dim], proj[:, c_dim:2 * c_dim], proj[:, 2 * c_dim:3 * c_dim]
    agg, att = graph_attention(q, k, v, edges[-1], n_heads)

    # skip projection + clf_nodes gather + classifier MLP fused in one kernel
    prediction = pallas_skip_mlp(embedding[clf_nodes], agg[clf_nodes],
                                 cg["ws"], cg["bs"],
                                 params["clf1_w"], params["clf1_b"],
                                 params["clf2_w"], params["clf2_b"],
                                 params["clf3_w"], params["clf3_b"])

    # --- scatter_max over attention to pick most-attended source node -------
    att_sum = att.sum(1).reshape(-1)                                   # [E]
    src_e = edges[-1][0].reshape(-1)
    dst_e = edges[-1][1].reshape(-1)
    num_e = att_sum.shape[0]
    seg_max = jax.ops.segment_max(att_sum, dst_e, num_segments=num_nodes)
    is_max = att_sum >= seg_max[dst_e]
    argmax = jax.ops.segment_min(
        jnp.where(is_max, jnp.arange(num_e, dtype=jnp.int32), num_e),
        dst_e, num_segments=num_nodes)
    argmax = jnp.minimum(argmax, num_e - 1)        # guard: nodes w/o incoming edges
    attended_src = src_e[argmax[clf_nodes]]
    return prediction, attended_src


# ----------------------------------------------------------------------------
# Deterministic parameter initialization (shapes from __init__)
# ----------------------------------------------------------------------------
def init_params(key, embedding_size, n_heads, n_layers):
    def uniform(k, shape, scale):
        return jax.random.uniform(k, shape, jnp.float32, -scale, scale)

    def mgt_fused_qkvs(k, dim):
        ks = jax.random.split(k, 8)
        s = 1.0 / math.sqrt(dim)
        ws = [uniform(ks[j], (dim, dim), s) for j in range(4)]          # q,k,v,skip
        bs = [uniform(ks[4 + j], (1, dim), s) for j in range(4)]
        return {"w_qkvs": jnp.concatenate(ws, axis=1),                  # [dim, 4*dim]
                "b_qkvs": jnp.concatenate(bs, axis=1)}                  # [1, 4*dim]

    def mgt_clf(k, dim):
        ks = jax.random.split(k, 8)
        s = 1.0 / math.sqrt(dim)
        ws = [uniform(ks[j], (dim, dim), s) for j in range(4)]          # q,k,v,skip
        bs = [uniform(ks[4 + j], (1, dim), s) for j in range(4)]
        return {"w_qkv": jnp.concatenate(ws[:3], axis=1),               # [dim, 3*dim]
                "b_qkv": jnp.concatenate(bs[:3], axis=1),
                "ws": ws[3], "bs": bs[3]}

    def lstm_dir(k, in_dim=64, hidden=64):
        ks = jax.random.split(k, 12)
        s = 1.0 / math.sqrt(hidden)
        wx = jnp.concatenate([uniform(ks[j], (in_dim, hidden), s) for j in range(4)], 1)
        wh = jnp.concatenate([uniform(ks[4 + j], (hidden, hidden), s) for j in range(4)], 1)
        b = jnp.concatenate([uniform(ks[8 + j], (1, hidden), s) for j in range(4)], 1)
        return wx, wh, b                                                # fused i|f|g|o

    keys = jax.random.split(key, n_layers + 5)
    params = {"neighbors_gnn": [mgt_fused_qkvs(keys[i], 64) for i in range(n_layers)],
              "clf_gnn": mgt_clf(keys[n_layers], embedding_size)}

    wx_f, wh_f, b_f = lstm_dir(keys[n_layers + 1])
    wx_b, wh_b, b_b = lstm_dir(keys[n_layers + 2])
    params["lstm_wx"] = jnp.stack([wx_f, wx_b], axis=0)                 # [2, 64, 256]
    params["lstm_wh"] = jnp.stack([wh_f, wh_b], axis=0)                 # [2, 64, 256]
    params["lstm_b"] = jnp.stack([b_f, b_b], axis=0)                    # [2, 1, 256]

    ck = jax.random.split(keys[n_layers + 3], 6)
    params["clf1_w"] = uniform(ck[0], (embedding_size, 32), 1 / math.sqrt(embedding_size))
    params["clf1_b"] = uniform(ck[1], (1, 32), 1 / math.sqrt(embedding_size))
    params["clf2_w"] = uniform(ck[2], (32, 16), 1 / math.sqrt(32))
    params["clf2_b"] = uniform(ck[3], (1, 16), 1 / math.sqrt(32))
    params["clf3_w"] = uniform(ck[4], (16, 1), 1 / math.sqrt(16))
    params["clf3_b"] = uniform(ck[5], (1, 1), 1 / math.sqrt(16))
    return params


# ----------------------------------------------------------------------------
# Demo
# ----------------------------------------------------------------------------
if __name__ == "__main__":
    key = jax.random.PRNGKey(0)
    embedding_size, n_heads, n_layers = 96, 4, 2   # embedding_size = 64 (LSTM) + 32 extra
    N, T, E_rand = 16, 3, 32                       # nodes, graph snapshots, random edges

    k_params, k_emb, k_edge = jax.random.split(key, 3)
    params = init_params(k_params, embedding_size, n_heads, n_layers)

    emb_keys = jax.random.split(k_emb, T)
    embeddings = [jax.random.normal(k, (N, embedding_size), jnp.float32) for k in emb_keys]

    edge_keys = jax.random.split(k_edge, T)
    loops = jnp.arange(N, dtype=jnp.int32)
    edges = []
    for k in edge_keys:
        ks, kd = jax.random.split(k)
        src = jnp.concatenate([loops, jax.random.randint(ks, (E_rand,), 0, N, jnp.int32)])
        dst = jnp.concatenate([loops, jax.random.randint(kd, (E_rand,), 0, N, jnp.int32)])
        edges.append(jnp.stack([src, dst]))        # [2, N + E_rand] = [2, 48]

    clf_neighbors = jnp.array([0, 2, 4, 6, 8, 10, 12, 14], dtype=jnp.int32)
    clf_nodes = jnp.array([1, 3, 5, 7], dtype=jnp.int32)

    prediction, attended_src = predict_model_forward(
        params, embeddings, edges, clf_neighbors, clf_nodes, n_layers, n_heads)

    jax.block_until_ready(prediction)
    jax.block_until_ready(attended_src)
    assert prediction.shape == (clf_nodes.shape[0], 1)
    assert attended_src.shape == (clf_nodes.shape[0],)
    print("KERNEL_OK")
</pallas_src>

<mosaic_0001>
module attributes {stable_mosaic.version = 11 : i64} {
  func.func @_linear_kernel(%arg0: memref<48x64xf32, #tpu.memory_space<vmem>>, %arg1: memref<64x256xf32, #tpu.memory_space<vmem>>, %arg2: memref<1x256xf32, #tpu.memory_space<vmem>>, %arg3: memref<48x256xf32, #tpu.memory_space<vmem>>) attributes {dimension_semantics = [], scalar_prefetch = 0 : i64, scratch_operands = 0 : i64, tpu.core_type = #tpu.core_type<tc>} {
    %c0 = arith.constant 0 : index
    %c0_0 = arith.constant 0 : index
    %0 = vector.load %arg0[%c0, %c0_0] : memref<48x64xf32, #tpu.memory_space<vmem>>, vector<48x64xf32>
    %c0_1 = arith.constant 0 : index
    %c0_2 = arith.constant 0 : index
    %1 = vector.load %arg1[%c0_1, %c0_2] : memref<64x256xf32, #tpu.memory_space<vmem>>, vector<64x256xf32>
    %cst = arith.constant dense<0.000000e+00> : vector<48x256xf32>
    %2 = tpu.matmul %0, %1, %cst {dimension_numbers = #tpu.dot_dimension_numbers<[1], [0], [0], [1], [0, 0, 1, 1], [], []>} : vector<48x64xf32>, vector<64x256xf32>, vector<48x256xf32> -> vector<48x256xf32>
    %c0_3 = arith.constant 0 : index
    %c0_4 = arith.constant 0 : index
    %3 = vector.load %arg2[%c0_3, %c0_4] : memref<1x256xf32, #tpu.memory_space<vmem>>, vector<1x256xf32>
    %4 = vector.broadcast %3 : vector<1x256xf32> to vector<48x256xf32>
    %5 = arith.addf %2, %4 : vector<48x256xf32>
    %c0_5 = arith.constant 0 : index
    %c0_6 = arith.constant 0 : index
    %6 = vector.load %arg3[%c0_5, %c0_6] : memref<48x256xf32, #tpu.memory_space<vmem>>, vector<48x256xf32>
    tpu.vector_store %arg3[%c0_5, %c0_6], %5 {strides = array<i32>} : memref<48x256xf32, #tpu.memory_space<vmem>>, vector<48x256xf32>,
    return
  }
}

</mosaic_0001>

<bundles_post_ra>
// kernel: tpu_custom_call.1
= control target key start
LH: loop header
LB: loop body
LE: loop exit
PB: predicated region body
PF: predicated region fallthrough
CT: control target
= control target key end

     0   :  { %8 = vsyncpa [#allocation3], 0  ;;  %s375_s0 = inlined_call_operand.hbm [shape: f32[48,64], index: 0, kind: input, shape index: {}]   ;;  %s376_s1 = inlined_call_operand.hbm [shape: f32[64,256], index: 1, kind: input, shape index: {}]   ;;  %s377_s2 = inlined_call_operand.vmem [shape: f32[1,256], index: 2, kind: input, shape index: {}]   ;;  %s378_s3 = inlined_call_operand.hbm [shape: f32[48,256], index: 3, kind: output, shape index: {}]  }
   0x1   :  { %9 = vsyncpa [#allocation6], 0 }
   0x2   :  { %10 = vsyncpa [#allocation4], 0  ;;  %s323_s12 = smov [#allocation2]  }
   0x3   :  { %s16_s13 = sshll.u32 %s323_s12, 4  ;;  %s17_s13 = int_to_ptr.vmem [resolvable:$true] %s16_s13 }
   0x4   :  { %s265_s14 = scalar_lea.vmem %s17_s13, 768  ;;  %p270_p1 = scmp.lt.s32.totalorder %s17_s13, %s17_s13 }
   0x5   :  { %p266_p0 = scmp.ne.s32.totalorder %s17_s13, %s265_s14  ;;  %p271_p2 = scmp.lt.s32.totalorder %s265_s14, %s265_s14 }
   0x7   :  { %p272_p3 = por %p271_p2, %p270_p1 }
   0x9   :  { %p273_p4 = pnand %p272_p3, %p266_p0 }
   0xb   :  { %276 = shalt.err (!%p273_p4)
}
   0xc   :  { %s324_s15 = smov 128   ;;  %s325_s16 = smov 8  }
   0xd   :  { %22 = dma.hbm_to_vmem [thread:$0]  %s375_s0, 768, %s17_s13, [#allocation3], %s324_s15, %s324_s15, %s325_s16  }
   0xe   :  { %s326_s19 = smov [#allocation5]  }
   0xf   :  { %s28_s20 = sshll.u32 %s326_s19, 4  ;;  %s29_s20 = int_to_ptr.vmem [resolvable:$true] %s28_s20 }
  0x10   :  { %s285_s21 = scalar_lea.vmem %s29_s20, 2048  ;;  %p290_p6 = scmp.lt.s32.totalorder %s29_s20, %s29_s20 }
  0x11   :  { %p286_p5 = scmp.ne.s32.totalorder %s29_s20, %s285_s21  ;;  %p291_p7 = scmp.lt.s32.totalorder %s285_s21, %s285_s21 }
  0x13   :  { %p292_p8 = por %p291_p7, %p290_p6 }
  0x15   :  { %p293_p9 = pnand %p292_p8, %p286_p5 }
  0x17   :  { %296 = shalt.err (!%p293_p9)
}
  0x18   :  { %s327_s22 = smov 256   ;;  %s328_s23 = smov 16  }
  0x19   :  { %34 = dma.hbm_to_vmem [thread:$0]  %s376_s1, 2048, %s29_s20, [#allocation6], %s327_s22, %s327_s22, %s328_s23  }
  0x1a   :  { %317 = dma.done.wait [#allocation3], 768  }
  0x1b   :  { %318 = vsyncadd [#allocation3], 4294966528 }
  0x1c   :  { %319 = dma.done.wait [#allocation6], 2048  }
  0x1d   :  { %320 = vsyncadd [#allocation6], 4294965248  ;;  %v329_v0 = vmov 0.0   ;;  %v64_v1 = vld [vmem:[#allocation5 + $0x78] sm:$0xff]  ;;  %v63_v2 = vld [vmem:[#allocation5 + $0x70] sm:$0xff]  ;;  %vm77_vm0 = vcmask 523264   ;;  %v67_v23 = vlaneseq }
  0x1e   :  { %160 = vmatprep.mubr.f32.mxu0 %v329_v0  ;;  %178 = vmatprep.mubr.f32.mxu1 %v329_v0  ;;  %v62_v3 = vld [vmem:[#allocation5 + $0x68] sm:$0xff]  ;;  %v61_v4 = vld [vmem:[#allocation5 + $0x60] sm:$0xff]  ;;  %v60_v5 = vld [vmem:[#allocation5 + $0x58] sm:$0xff] }
  0x1f   :  { %112 = vmatprep.subr.mxu0 %v64_v1  ;;  %233 = vmatprep.subr.mxu1 %v64_v1  ;;  %v59_v6 = vld [vmem:[#allocation5 + $0x50] sm:$0xff]  ;;  %v58_v7 = vld [vmem:[#allocation5 + $0x48] sm:$0xff]  ;;  %v57_v8 = vld [vmem:[#allocation5 + $0x40] sm:$0xff]  ;;  %v68_v24 = vshrl.u32 %v67_v23, 7 }
  0x20   :  { %113 = vmatpush1.msra.mxu0 %v63_v2  ;;  %241 = vmatpush1.msra.mxu1 %v63_v2  ;;  %v56_v9 = vld [vmem:[#allocation5 + $0x38] sm:$0xff]  ;;  %v55_v10 = vld [vmem:[#allocation5 + $0x30] sm:$0xff]  ;;  %v54_v11 = vld [vmem:[#allocation5 + $0x28] sm:$0xff] }
  0x21   :  { %114 = vmatprep.subr.mxu0 %v62_v3  ;;  %234 = vmatprep.subr.mxu1 %v62_v3  ;;  %v53_v12 = vld [vmem:[#allocation5 + $0x20] sm:$0xff]  ;;  %v52_v13 = vld [vmem:[#allocation5 + $0x18] sm:$0xff]  ;;  %v51_v14 = vld [vmem:[#allocation5 + $0x10] sm:$0xff]  ;;  %v69_v25 = vsub.s32 0, %v68_v24  ;;  %v73_v27 = vsub.s32 1, %v68_v24 }
  0x22   :  { %115 = vmatpush1.msra.mxu0 %v61_v4  ;;  %242 = vmatpush1.msra.mxu1 %v61_v4  ;;  %v50_v15 = vld [vmem:[#allocation5 + $0x8] sm:$0xff]  ;;  %v49_v16 = vld [vmem:[#allocation5] sm:$0xff]  ;;  %v43_v17 = vld [vmem:[#allocation2] sm:$0xff] }
  0x23   :  { %116 = vmatprep.subr.mxu0 %v60_v5  ;;  %235 = vmatprep.subr.mxu1 %v60_v5  ;;  %v46_v18 = vld [vmem:[#allocation2 + $0x18] sm:$0xff]  ;;  %v44_v19 = vld [vmem:[#allocation2 + $0x8] sm:$0xff]  ;;  %v47_v20 = vld [vmem:[#allocation2 + $0x20] sm:$0xff] }
  0x24   :  { %117 = vmatpush1.msra.mxu0 %v59_v6  ;;  %243 = vmatpush1.msra.mxu1 %v59_v6  ;;  %v45_v21 = vld [vmem:[#allocation2 + $0x10] sm:$0xff]  ;;  %v48_v22 = vld [vmem:[#allocation2 + $0x28] sm:$0xff]  ;;  %v65_v26 = vld [vmem:[%s377_s2] sm:$0x3]  ;;  %s330_s2 = smov [#allocation7]  }
  0x25   :  { %118 = vmatprep.subr.mxu0 %v58_v7  ;;  %236 = vmatprep.subr.mxu1 %v58_v7  ;;  %v70_v28 = vrot.slane %v65_v26, %v69_v25  ;;  %v74_v29 = vrot.slane %v65_v26, %v73_v27  ;;  %s214_s26 = sshll.u32 %s330_s2, 4  ;;  %s215_s26 = int_to_ptr.vmem [resolvable:$true] %s214_s26 }
  0x26   :  { %119 = vmatpush1.msra.mxu0 %v57_v8  ;;  %244 = vmatpush1.msra.mxu1 %v57_v8  ;;  %s297_s27 = scalar_lea.vmem %s215_s26, 1536  ;;  %p302_p11 = scmp.lt.s32.totalorder %s215_s26, %s215_s26 }
  0x27   :  { %120 = vmatprep.subr.mxu0 %v56_v9  ;;  %237 = vmatprep.subr.mxu1 %v56_v9  ;;  %p298_p10 = scmp.ne.s32.totalorder %s215_s26, %s297_s27  ;;  %p303_p12 = scmp.lt.s32.totalorder %s297_s27, %s297_s27 }
  0x28   :  { %121 = vmatpush1.msra.mxu0 %v55_v10  ;;  %245 = vmatpush1.msra.mxu1 %v55_v10 }
  0x29   :  { %122 = vmatprep.subr.mxu0 %v54_v11  ;;  %238 = vmatprep.subr.mxu1 %v54_v11  ;;  %p304_p13 = por %p303_p12, %p302_p11 }
  0x2a   :  { %123 = vmatpush1.msra.mxu0 %v53_v12  ;;  %246 = vmatpush1.msra.mxu1 %v53_v12 }
  0x2b   :  { %124 = vmatprep.subr.mxu0 %v52_v13  ;;  %239 = vmatprep.subr.mxu1 %v52_v13  ;;  %p305_p0 = pnand %p304_p13, %p298_p10 }
  0x2c   :  { %125 = vmatpush1.msra.mxu0 %v51_v14  ;;  %247 = vmatpush1.msra.mxu1 %v51_v14 }
  0x2d   :  { %126 = vmatprep.subr.mxu0 %v50_v15  ;;  %240 = vmatprep.subr.mxu1 %v50_v15 }
  0x2e   :  { %127 = vmatpush1.msra.mxu0 %v49_v16  ;;  %248 = vmatpush1.msra.mxu1 %v49_v16 }
  0x2f   :  { %227 = vmatmul.mubr.msk.f32.vlgmr.msra.gmra.mxu0 %vm77_vm0, %v43_v17  ;;  %230 = vmatmul.mubr.msk.f32.vlgmr.msra.gmra.mxu1 %vm77_vm0, %v46_v18 }
  0x30   :  { %166 = vmatprep.mubr.f32.mxu0 %v329_v0  ;;  %184 = vmatprep.mubr.f32.mxu1 %v329_v0 }
  0x33   :  { %228 = vmatmul.mubr.msk.f32.gmra.mxu0 %vm77_vm0, %v44_v19  ;;  %231 = vmatmul.mubr.msk.f32.gmra.mxu1 %vm77_vm0, %v47_v20 }
  0x34   :  { %172 = vmatprep.mubr.f32.mxu0 %v329_v0  ;;  %190 = vmatprep.mubr.f32.mxu1 %v329_v0 }
  0x37   :  { %229 = vmatmul.mubr.msk.f32.gmra.mxu0 %vm77_vm0, %v45_v21  ;;  %232 = vmatmul.mubr.msk.f32.gmra.mxu1 %vm77_vm0, %v48_v22 }
  0xef   :  { %v162_v30 = vpop.f32.mrf.mxu0  ;;  %v180_v31 = vpop.f32.mrf.mxu1 }
  0xf0   :  { %v163_v32 = vadd.f32 %v162_v30, %v70_v28  ;;  %v181_v33 = vadd.f32 %v180_v31, %v70_v28 }
  0xf1   :  { %v164_v34 = vpop.f32.mrf.mxu0  ;;  %v182_v35 = vpop.f32.mrf.mxu1 }
  0xf2   :  { %197 = vst [vmem:[#allocation7] sm:$0xff] %v163_v32  ;;  %203 = vst [vmem:[#allocation7 + $0x30] sm:$0xff] %v181_v33  ;;  %v165_v36 = vadd.f32 %v164_v34, %v74_v29  ;;  %v183_v37 = vadd.f32 %v182_v35, %v74_v29 }
  0xf3   :  { %v168_v38 = vpop.f32.mrf.mxu0  ;;  %v186_v39 = vpop.f32.mrf.mxu1 }
  0xf4   :  { %198 = vst [vmem:[#allocation7 + $0x8] sm:$0xff] %v165_v36  ;;  %204 = vst [vmem:[#allocation7 + $0x38] sm:$0xff] %v183_v37  ;;  %v169_v40 = vadd.f32 %v168_v38, %v70_v28  ;;  %v187_v41 = vadd.f32 %v186_v39, %v70_v28 }
  0xf5   :  { %v170_v42 = vpop.f32.mrf.mxu0  ;;  %v188_v43 = vpop.f32.mrf.mxu1 }
  0xf6   :  { %199 = vst [vmem:[#allocation7 + $0x10] sm:$0xff] %v169_v40  ;;  %205 = vst [vmem:[#allocation7 + $0x40] sm:$0xff] %v187_v41  ;;  %v171_v44 = vadd.f32 %v170_v42, %v74_v29  ;;  %v189_v45 = vadd.f32 %v188_v43, %v74_v29 }
  0xf7   :  { %v174_v46 = vpop.f32.mrf.mxu0  ;;  %v192_v47 = vpop.f32.mrf.mxu1 }
  0xf8   :  { %200 = vst [vmem:[#allocation7 + $0x18] sm:$0xff] %v171_v44  ;;  %206 = vst [vmem:[#allocation7 + $0x48] sm:$0xff] %v189_v45  ;;  %v175_v48 = vadd.f32 %v174_v46, %v70_v28  ;;  %v193_v49 = vadd.f32 %v192_v47, %v70_v28 }
  0xf9   :  { %v176_v50 = vpop.f32.mrf.mxu0  ;;  %v194_v51 = vpop.f32.mrf.mxu1 }
  0xfa   :  { %201 = vst [vmem:[#allocation7 + $0x20] sm:$0xff] %v175_v48  ;;  %207 = vst [vmem:[#allocation7 + $0x50] sm:$0xff] %v193_v49  ;;  %v177_v52 = vadd.f32 %v176_v50, %v74_v29  ;;  %v195_v53 = vadd.f32 %v194_v51, %v74_v29 }
  0xfc   :  { %202 = vst [vmem:[#allocation7 + $0x28] sm:$0xff] %v177_v52  ;;  %208 = vst [vmem:[#allocation7 + $0x58] sm:$0xff] %v195_v53 }
  0xfd   :  { %308 = shalt.err (!%p305_p0)
}
  0xfe   :  { %220 = dma.vmem_to_hbm [thread:$0]  %s215_s26, 1536, %s378_s3, [#allocation4], %s327_s22, %s327_s22, %s328_s23  }
  0xff   :  { %321 = dma.done.wait [#allocation4], 1536  }
 0x100   :  { %322 = vsyncadd [#allocation4], 4294965760 }
 0x101   :  { %224 = vsyncpa [#allocation3], 1 }
 0x102   :  { %225 = vsyncpa [#allocation6], 1 }
 0x103   :  { %226 = vsyncpa [#allocation4], 1 }

</bundles_post_ra>
